<compile_context>
chip_gen: v6e
topology: v6e:2x2x1
jax: 0.10.0
libtpu: 0.0.40
codegen_flags: <defaults>
</compile_context>

<pallas_src>
import functools

import jax
import jax.numpy as jnp
from jax.experimental import pallas as pl
from jax.experimental.pallas import tpu as pltpu


def _round_up(x, m):
    return (x + m - 1) // m * m


# ----------------------------------------------------------------------------
# Pallas kernel: one (TM, K) @ (K, Coutp) MXU contraction + BN shift (+ ReLU)
# ----------------------------------------------------------------------------
def _conv_bn_kernel(taps_ref, w_ref, shift_ref, out_ref, *, apply_relu):
    # taps_ref : (TM, K)      bf16 im2col tile (K = 9*Cin, tap-major / Cin-minor)
    # w_ref    : (K, Coutp)   bf16 weights with BN scale folded in (grid-invariant)
    # shift_ref: (1, Coutp)   f32  beta - mean * scale                (grid-invariant)
    # out_ref  : (TM, Coutp)
    y = jnp.dot(taps_ref[...], w_ref[...], preferred_element_type=jnp.float32)
    y = y + shift_ref[...]
    if apply_relu:
        y = jnp.maximum(y, 0.0)
    out_ref[...] = y.astype(out_ref.dtype)


# ----------------------------------------------------------------------------
# ConvBlock forward body (NHWC): 3x3 / stride-2 / pad-1 conv + BN + opt. ReLU
# ----------------------------------------------------------------------------
def conv_bn_act(x_nhwc, w_hwio, gamma, beta, mean, var, *, eps=1e-5, relu=True,
                compute_dtype=jnp.bfloat16, tm=512):
    N, H, W, Cin = x_nhwc.shape
    KH, KW, _, Cout = w_hwio.shape
    assert (KH, KW) == (3, 3)
    OH = (H + 2 - 3) // 2 + 1
    OW = (W + 2 - 3) // 2 + 1
    M = OH * OW
    K = 9 * Cin

    # --- fold inference BatchNorm into the conv weights ---------------------
    scale = gamma / jnp.sqrt(var + eps)                      # (Cout,)
    shift = (beta - mean * scale).astype(jnp.float32)        # (Cout,)
    w_k = (w_hwio.reshape(K, Cout) * scale[None, :]).astype(compute_dtype)

    # --- im2col as a single (N, M, 9*Cin) slab in the MXU compute dtype -----
    # (tap index adjacent to Cin so the whole conv is ONE matmul per tile)
    xp = jnp.pad(x_nhwc, ((0, 0), (1, 1), (1, 1), (0, 0)))
    taps = [xp[:, kh:kh + 2 * OH:2, kw:kw + 2 * OW:2, :]
            for kh in range(3) for kw in range(3)]
    taps = jnp.stack(taps, axis=-2).reshape(N, M, K).astype(compute_dtype)

    # --- lane-dense output: pad Cout to a multiple of 128 -------------------
    Coutp = _round_up(Cout, 128)
    if Coutp != Cout:
        w_k = jnp.pad(w_k, ((0, 0), (0, Coutp - Cout)))
        shift = jnp.pad(shift, (0, Coutp - Cout))
    shift = shift.reshape(1, Coutp)

    # --- tile the M = OH*OW axis ---------------------------------------------
    tm_eff = min(tm, _round_up(M, 16))        # multiple of 16 (bf16 sublanes)
    m_total = _round_up(M, tm_eff)
    if m_total != M:
        taps = jnp.pad(taps, ((0, 0), (0, m_total - M), (0, 0)))
    grid_m = m_total // tm_eff

    kernel = functools.partial(_conv_bn_kernel, apply_relu=relu)

    out = pl.pallas_call(
        kernel,
        out_shape=jax.ShapeDtypeStruct((N, m_total, Coutp), x_nhwc.dtype),
        grid_spec=pltpu.PrefetchScalarGridSpec(
            num_scalar_prefetch=0,
            grid=(N, grid_m),
            in_specs=[
                # per-image, per-M-tile im2col tile
                pl.BlockSpec((pl.Squeezed(), tm_eff, K), lambda n, m: (n, m, 0)),
                # weights + shift are grid-invariant -> stay resident in VMEM
                pl.BlockSpec((K, Coutp), lambda n, m: (0, 0)),
                pl.BlockSpec((1, Coutp), lambda n, m: (0, 0)),
            ],
            out_specs=pl.BlockSpec((pl.Squeezed(), tm_eff, Coutp),
                                   lambda n, m: (n, m, 0)),
        ),
        compiler_params=pltpu.CompilerParams(
            # both axes independent -> megacore / v7x 2-TC sharding
            dimension_semantics=("parallel", "parallel"),
        ),
    )(taps, w_k, shift)

    return out[:, :M, :Cout].reshape(N, OH, OW, Cout)


# ----------------------------------------------------------------------------
# Public ConvBlock API (NCHW in / NCHW out, like the PyTorch module)
# ----------------------------------------------------------------------------
def conv_block_forward(x_nchw, params, activation=True):
    x = jnp.transpose(x_nchw, (0, 2, 3, 1))          # NCHW -> NHWC
    g, b, m, v = params["bn"]
    y = conv_bn_act(x, params["w"], g, b, m, v, relu=activation)
    return jnp.transpose(y, (0, 3, 1, 2))            # NHWC -> NCHW


def init_conv_block(key, cin, cout):
    std = (2.0 / (cin * 9)) ** 0.5
    w = jax.random.normal(key, (3, 3, cin, cout), jnp.float32) * std   # HWIO
    gamma = 1.0 + 0.002 * jnp.arange(cout, dtype=jnp.float32)
    beta = 0.01 * jnp.arange(cout, dtype=jnp.float32) - 0.05
    mean = 0.001 * jnp.arange(cout, dtype=jnp.float32)
    var = 1.0 + 0.002 * jnp.arange(cout, dtype=jnp.float32)
    return {"w": w, "bn": (gamma, beta, mean, var)}


# ----------------------------------------------------------------------------
# Pure-JAX reference for a silent correctness check
# ----------------------------------------------------------------------------
def _ref_conv_block(x_nchw, params, activation=True, eps=1e-5):
    x = jnp.transpose(x_nchw, (0, 2, 3, 1))
    y = jax.lax.conv_general_dilated(
        x, params["w"],
        window_strides=(2, 2),
        padding=((1, 1), (1, 1)),
        dimension_numbers=("NHWC", "HWIO", "NHWC"),
    )
    g, b, m, v = params["bn"]
    y = (y - m) / jnp.sqrt(v + eps) * g + b
    if activation:
        y = jnp.maximum(y, 0.0)
    return jnp.transpose(y, (0, 3, 1, 2))


if __name__ == "__main__":
    key = jax.random.PRNGKey(0)
    kx, k1, k2 = jax.random.split(key, 3)

    # small deterministic input: batch=2, channels=4, 16x16 spatial (NCHW)
    x = jax.random.normal(kx, (2, 4, 16, 16), jnp.float32)
    blk1 = init_conv_block(k1, 4, 64)     # ConvBlock(4, 64, activation=True)
    blk2 = init_conv_block(k2, 64, 128)   # ConvBlock(64, 128, activation=False)

    y = conv_block_forward(x, blk1, activation=True)
    y = conv_block_forward(y, blk2, activation=False)
    y = jax.block_until_ready(y)
    assert y.shape == (2, 128, 4, 4), y.shape

    ref = _ref_conv_block(x, blk1, activation=True)
    ref = jax.block_until_ready(_ref_conv_block(ref, blk2, activation=False))

    # bf16 MXU inputs with f32 accumulation -> relaxed tolerance vs f32 ref
    max_err = float(jnp.max(jnp.abs(y - ref)))
    assert jnp.allclose(y, ref, rtol=1e-1, atol=1e-1), max_err

    print("KERNEL_OK")
</pallas_src>

<mosaic_0001>
module attributes {stable_mosaic.version = 11 : i64} {
  func.func @_conv_bn_kernel(%arg0: i32, %arg1: i32, %arg2: memref<1x64x36xbf16, #tpu.memory_space<vmem>>, %arg3: memref<36x128xbf16, #tpu.memory_space<vmem>>, %arg4: memref<1x128xf32, #tpu.memory_space<vmem>>, %arg5: memref<1x64x128xf32, #tpu.memory_space<vmem>>) attributes {dimension_semantics = [#tpu.dimension_semantics<parallel>, #tpu.dimension_semantics<parallel>], iteration_bounds = array<i64: 2, 1>, scalar_prefetch = 0 : i64, scratch_operands = 0 : i64, tpu.core_type = #tpu.core_type<tc>, window_params = [{transform_indices = @transform_0, window_bounds = array<i64: 1, 64, 36>}, {pipeline_mode = #tpu.pipeline_mode<synchronous>, transform_indices = @transform_1, window_bounds = array<i64: 36, 128>}, {pipeline_mode = #tpu.pipeline_mode<synchronous>, transform_indices = @transform_2, window_bounds = array<i64: 1, 128>}, {transform_indices = @transform_3, window_bounds = array<i64: 1, 64, 128>}]} {
    %c0 = arith.constant 0 : index
    %c0_0 = arith.constant 0 : index
    %c0_1 = arith.constant 0 : index
    %0 = vector.load %arg2[%c0, %c0_0, %c0_1] : memref<1x64x36xbf16, #tpu.memory_space<vmem>>, vector<1x64x36xbf16>
    %1 = vector.shape_cast %0 : vector<1x64x36xbf16> to vector<64x36xbf16>
    %c0_2 = arith.constant 0 : index
    %c0_3 = arith.constant 0 : index
    %2 = vector.load %arg3[%c0_2, %c0_3] : memref<36x128xbf16, #tpu.memory_space<vmem>>, vector<36x128xbf16>
    %cst = arith.constant dense<0.000000e+00> : vector<64x128xf32>
    %3 = tpu.matmul %1, %2, %cst {dimension_numbers = #tpu.dot_dimension_numbers<[1], [0], [0], [1], [0, 0, 1, 1], [], []>} : vector<64x36xbf16>, vector<36x128xbf16>, vector<64x128xf32> -> vector<64x128xf32>
    %c0_4 = arith.constant 0 : index
    %c0_5 = arith.constant 0 : index
    %4 = vector.load %arg4[%c0_4, %c0_5] : memref<1x128xf32, #tpu.memory_space<vmem>>, vector<1x128xf32>
    %5 = vector.broadcast %4 : vector<1x128xf32> to vector<64x128xf32>
    %6 = arith.addf %3, %5 : vector<64x128xf32>
    %cst_6 = arith.constant 0.000000e+00 : f32
    %7 = vector.broadcast %cst_6 : f32 to vector<64x128xf32>
    %8 = arith.maximumf %6, %7 : vector<64x128xf32>
    %c0_7 = arith.constant 0 : index
    %c0_8 = arith.constant 0 : index
    %c0_9 = arith.constant 0 : index
    %9 = vector.load %arg5[%c0_7, %c0_8, %c0_9] : memref<1x64x128xf32, #tpu.memory_space<vmem>>, vector<1x64x128xf32>
    %10 = vector.shape_cast %9 : vector<1x64x128xf32> to vector<64x128xf32>
    %11 = vector.shape_cast %8 : vector<64x128xf32> to vector<1x64x128xf32>
    tpu.vector_store %arg5[%c0_7, %c0_8, %c0_9], %11 {strides = array<i32>} : memref<1x64x128xf32, #tpu.memory_space<vmem>>, vector<1x64x128xf32>,
    return
  }
  func.func @transform_0(%arg0: i32, %arg1: i32) -> (i32, i32, i32) {
    %c0_i32 = arith.constant 0 : i32
    %c0_i32_0 = arith.constant 0 : i32
    return %arg0, %arg1, %c0_i32 : i32, i32, i32
  }
  func.func @transform_1(%arg0: i32, %arg1: i32) -> (i32, i32) {
    %c0_i32 = arith.constant 0 : i32
    %c0_i32_0 = arith.constant 0 : i32
    %c0_i32_1 = arith.constant 0 : i32
    return %c0_i32, %c0_i32_0 : i32, i32
  }
  func.func @transform_2(%arg0: i32, %arg1: i32) -> (i32, i32) {
    %c0_i32 = arith.constant 0 : i32
    %c0_i32_0 = arith.constant 0 : i32
    %c0_i32_1 = arith.constant 0 : i32
    return %c0_i32, %c0_i32_0 : i32, i32
  }
  func.func @transform_3(%arg0: i32, %arg1: i32) -> (i32, i32, i32) {
    %c0_i32 = arith.constant 0 : i32
    %c0_i32_0 = arith.constant 0 : i32
    return %arg0, %arg1, %c0_i32 : i32, i32, i32
  }
}

</mosaic_0001>

<bundles_post_ra>
// kernel: tpu_custom_call.1
= control target key start
LH: loop header
LB: loop body
LE: loop exit
PB: predicated region body
PF: predicated region fallthrough
CT: control target
= control target key end

     0   :  { %8 = vsyncpa [#allocation3], 0  ;;  %s800_s0 = inlined_call_operand.vmem [shape: bf16[2,64,36], index: 0, kind: input, shape index: {}]   ;;  %s801_s1 = inlined_call_operand.vmem [shape: bf16[36,128], index: 1, kind: input, shape index: {}]   ;;  %s802_s2 = inlined_call_operand.vmem [shape: f32[1,128], index: 2, kind: input, shape index: {}]   ;;  %s803_s3 = inlined_call_operand.hbm [shape: f32[2,64,128], index: 3, kind: output, shape index: {}]  }
   0x1   :  { %10 = vsyncpa [#allocation3 + $0x1], 0  ;;  %s670_s12 = smov 0   ;;  %s672_s13 = smov 0  }
   0x2   :  { %s674_s14 = smov 0   ;;  %s676_s15 = smov 0  }
   0x3   :  { %s678_s16 = smov 0   ;;  %s680_s17 = smov 0  }
   0x4 LB: > { %s449_s18 = sadd.s32 4294967295, %s645_s17   ;;  %s450_s19 = sadd.s32 4294967294, %s645_s17   ;;  %s645_s17 = sphi %s680_s17, %s16_s17   ;;  %s641_s16 = sphi %s678_s16, %s810_s16   ;;  %s637_s15 = sphi %s676_s15, %s809_s15   ;;  %s633_s14 = sphi %s674_s14, %s808_s14   ;;  %s629_s13 = sphi %s672_s13, %s807_s13   ;;  %s625_s12 = sphi %s670_s12, %s806_s12  }
   0x5   : > { %s28_s20 = sadd.s32 1, %s641_s16  ;;  %s107_s21 = sadd.s32 1, %s633_s14 }
   0x6   : > { %p30_p0 = scmp.ge.s32.totalorder %s28_s20, 2  ;;  %p117_p1 = scmp.ne.s32.totalorder %s633_s14, %s629_s13 }
   0x7   : > { %p118_p2 = scmp.eq.s32.totalorder %s449_s18, 1  ;;  %p123_p3 = scmp.ne.s32.totalorder %s629_s13, %s625_s12 }
   0x8   : > { %s812_s20 = smov (%p30_p0, %s28_s20), 0  ;;  %p124_p5 = scmp.eq.s32.totalorder %s450_s19, 1 }
   0x9   : > { %p710_p4 = por %p118_p2, %p117_p1  ;;  %s102_s23 = ssub.s32 %s641_s16, %s812_s20 }
   0xa   : > { %p453_p6 = scmp.ge.s32.totalorder %s645_s17, 1  ;;  %p105_p7 = scmp.eq.s32.totalorder %s102_s23, 0 }
   0xb   : > { %p717_p8 = por %p124_p5, %p123_p3  ;;  %p161_p9 = scmp.lt.s32.totalorder %s645_s17, 3 }
   0xc   : > { %s723_s25 = scalar_select %p105_p7, %s633_s14, %s107_s21  }
   0xd   : > { %p162_p10 = pnand %p453_p6, %p161_p9 }
   0xe   : > { %p190_p11 = scmp.lt.s32.totalorder (!%p162_p10), %s637_s15, 1  ;;  %s186_s10 = sand.u32 (!%p162_p10), 1, %s629_s13  }
   0xf   : > { %165 = sbr.rel (%p162_p10) target bundleno = 250 (0xfa), region = 32  ;;  %s454_s19 = sshll.u32 (!%p162_p10), %s186_s10, 6 }
  0x10   : > { %s188_s21 = scalar_lea.vmem (!%p162_p10), [#allocation2], %s454_s19  ;;  %s475_s23 = sshll.u32 (!%p162_p10), %s637_s15, 10 }
  0x11   : > { %s370_s26 = sshll.u32 (!%p162_p10), %s188_s21, 4  ;;  %s749_s29 = scalar_lea.hbm (!%p162_p10), %s803_s3, %s475_s23  ;;  %s751_s26 = int_to_ptr.vmem [resolvable:$true] %s370_s26 }
  0x12   : > { %s647_s4 = smov (!%p162_p10), [#allocation2]  }
  0x13   : > { %s573_s5 = sshll.u32 (!%p162_p10), %s647_s4, 4  ;;  %s574_s5 = int_to_ptr.vmem [resolvable:$false] %s573_s5 }
  0x14   : > { %v562_v0 = vld [vmem:[%s801_s1 + $0x10] ss:$0 sps:$4 sm:$0x33]   ;;  %vm269_vm0 = vcmask 1041408   ;;  %v563_v1 = vld [vmem:[%s801_s1 + $0x8] sm:$0xff]   ;;  %s191_s30 = scalar_select %p190_p11, %s637_s15, 1 }
  0x15   : > { %503 = vmatprep.subr.msk.bf16.mxu0 %vm269_vm0, %v562_v0  ;;  %504 = vmatprep.subr.msk.bf16.mxu1 %vm269_vm0, %v562_v0  ;;  %v271_v2 = vsel %vm269_vm0, %v562_v0, 0  ;;  %v564_v3 = vld [vmem:[%s801_s1] sm:$0xff]   ;;  %vm256_vm1 = vcmask 293888   ;;  %s755_s15 = scalar_lea.sflag [#allocation3], %s186_s10  ;;  %p576_p1 = scmp.lt.s32.totalorder %s751_s26, %s574_s5 }
  0x16   : > { %484 = vmatpush3.bf16.msra.mxu0 %v271_v2  ;;  %500 = vmatpush3.bf16.msra.mxu1 %v271_v2  ;;  %s474_s6 = sshll.u32 %s191_s30, 5  ;;  %v457_v8 = vld [vmem:[%s802_s2] ss:$0 sm:$0xff]  ;;  %s569_s30 = scalar_lea.vmem %s751_s26, 1024 }
  0x17   : > { %485 = vmatprep.subr.bf16.mxu0 %v563_v1  ;;  %498 = vmatprep.subr.bf16.mxu1 %v563_v1  ;;  %s197_s9 = scalar_lea.vmem %s800_s0, %s474_s6  ;;  %p570_p12 = scmp.ne.s32.totalorder %s751_s26, %s569_s30 }
  0x18   : > { %v565_v4 = vld [vmem:[%s197_s9] sm:$0xff]   ;;  %v566_v5 = vld [vmem:[%s197_s9 + $0x10] sm:$0xff]   ;;  %v567_v6 = vld [vmem:[%s197_s9 + $0x8] sm:$0xff]   ;;  %s575_s6 = scalar_lea.vmem %s574_s5, 2048 }
  0x19   : > { %489 = vmatprep.mubr.msk.bf16.mxu0 %vm256_vm1, %v565_v4  ;;  %493 = vmatprep.mubr.msk.bf16.mxu1 %vm256_vm1, %v566_v5  ;;  %v568_v7 = vld [vmem:[%s197_s9 + $0x18] sm:$0xff]   ;;  %p571_p13 = pnand %p570_p12, %p710_p4  ;;  %p577_p2 = scmp.lt.s32.totalorder %s575_s6, %s569_s30 }
  0x1a   : > { %486 = vmatpush3.bf16.msra.mxu0 %v563_v1  ;;  %501 = vmatpush3.bf16.msra.mxu1 %v563_v1 }
  0x1b   : > { %487 = vmatprep.subr.bf16.mxu0 %v564_v3  ;;  %499 = vmatprep.subr.bf16.mxu1 %v564_v3  ;;  %p572_p0 = pneg %p571_p13  ;;  %p578_p3 = por %p577_p2, %p576_p1 }
  0x1d   : > { %p579_p5 = pnand %p578_p3, %p572_p0 }
  0x1e   : > { %488 = vmatpush3.bf16.msra.mxu0 %v564_v3  ;;  %502 = vmatpush3.bf16.msra.mxu1 %v564_v3 }
  0x21   : > { %490 = vmatmul.mubr.msk.bf16.vlgmr.msra.gmra.mxu0 %vm256_vm1, %v567_v6  ;;  %494 = vmatmul.mubr.msk.bf16.vlgmr.msra.gmra.mxu1 %vm256_vm1, %v568_v7 }
  0xe1   : > { %v491_v9 = vpop.f32.mrf.mxu0  ;;  %v495_v10 = vpop.f32.mrf.mxu1 }
  0xe2   : > { %v316_v11 = vadd.f32 %v491_v9, %v457_v8  ;;  %v332_v12 = vadd.f32 %v495_v10, %v457_v8 }
  0xe3   : > { %v307_v13 = vpop.f32.mrf.mxu0  ;;  %v323_v14 = vpop.f32.mrf.mxu1 }
  0xe4   : > { %v340_v15 = vmax.f32 %v316_v11, 0.0  ;;  %v344_v16 = vmax.f32 %v332_v12, 0.0  ;;  %v308_v17 = vadd.f32 %v457_v8, %v307_v13  ;;  %v324_v18 = vadd.f32 %v457_v8, %v323_v14 }
  0xe5   : > { %v492_v19 = vpop.f32.mrf.mxu0  ;;  %v496_v20 = vpop.f32.mrf.mxu1 }
  0xe6   : > { %348 = vst [vmem:[%s188_s21 + $0x10] sm:$0xff] %v340_v15  ;;  %352 = vst [vmem:[%s188_s21 + $0x30] sm:$0xff] %v344_v16  ;;  %v338_v21 = vmax.f32 %v308_v17, 0.0  ;;  %v342_v22 = vmax.f32 %v324_v18, 0.0  ;;  %v319_v23 = vadd.f32 %v492_v19, %v457_v8  ;;  %v335_v24 = vadd.f32 %v496_v20, %v457_v8 }
  0xe7   : > { %v310_v25 = vpop.f32.mrf.mxu0  ;;  %v326_v26 = vpop.f32.mrf.mxu1 }
  0xe8   : > { %346 = vst [vmem:[%s188_s21] sm:$0xff] %v338_v21  ;;  %350 = vst [vmem:[%s188_s21 + $0x20] sm:$0xff] %v342_v22  ;;  %v341_v27 = vmax.f32 %v319_v23, 0.0  ;;  %v345_v28 = vmax.f32 %v335_v24, 0.0  ;;  %v311_v29 = vadd.f32 %v457_v8, %v310_v25  ;;  %v327_v30 = vadd.f32 %v457_v8, %v326_v26 }
  0xea   : > { %349 = vst [vmem:[%s188_s21 + $0x18] sm:$0xff] %v341_v27  ;;  %353 = vst [vmem:[%s188_s21 + $0x38] sm:$0xff] %v345_v28  ;;  %v339_v31 = vmax.f32 %v311_v29, 0.0  ;;  %v343_v32 = vmax.f32 %v327_v30, 0.0 }
  0xec   : > { %347 = vst [vmem:[%s188_s21 + $0x8] sm:$0xff] %v339_v31  ;;  %351 = vst [vmem:[%s188_s21 + $0x28] sm:$0xff] %v343_v32 }
  0xed   : > { %582 = shalt.err (!%p579_p5)
}
  0xee   : > { %s583_s7 = scalar_lea.hbm %s749_s29, 1024  ;;  %s587_s10 = scalar_lea.hbm %s803_s3, 2048 }
  0xef   : > { %p584_p6 = scmp.ne.s32.totalorder %s749_s29, %s583_s7  ;;  %p588_p10 = scmp.lt.s32.totalorder %s749_s29, %s803_s3 }
  0xf0   : > { %p589_p11 = scmp.lt.s32.totalorder %s587_s10, %s583_s7 }
  0xf1   : > { %p585_p7 = pnand %p584_p6, %p710_p4 }
  0xf2   : > { %p590_p12 = por %p589_p11, %p588_p10 }
  0xf3   : > { %p586_p9 = pneg %p585_p7 }
  0xf5   : > { %p591_p13 = pnand %p590_p12, %p586_p9 }
  0xf7   : > { %594 = shalt.err (!%p591_p13)
}
  0xf8   : > { %s648_s19 = smov 128   ;;  %s649_s21 = smov 8  }
  0xf9   : > { %505 = dma.vmem_to_hbm [thread:$0]  (%p710_p4), %s751_s26, 1024, %s749_s29, %s755_s15, %s648_s19, %s648_s19, %s649_s21  }
  0xfa PF: > { %p511_p0 = scmp.ge.s32.totalorder %s645_s17, 2  ;;  %s385_s23 = sand.u32 1, %s625_s12  }
  0xfb   : > { %s386_s27 = scalar_lea.sflag [#allocation3], %s385_s23 }
  0xfc   : > { %p508_p1 = pnand %p511_p0, %p717_p8 }
  0xfe   : > { %p509_p2 = pneg %p508_p1 }
 0x100   : > { %620 = dma.done.wait (%p509_p2), %s386_s27, 1024  }
 0x101   : > { %622 = vsyncadd (%p509_p2), %s386_s27, 4294966272  ;;  %s16_s17 = sadd.s32 1, %s645_s17   ;;  %s806_s12 = smov %s629_s13 }
 0x102   : > { %p13_p3 = scmp.ge.s32.totalorder %s16_s17, 4   ;;  %s807_s13 = smov %s633_s14 }
 0x103   : > { %s808_s14 = smov %s723_s25  ;;  %s809_s15 = smov %s641_s16 }
 0x104   : > { %s810_s16 = smov %s812_s20  ;;  %15 = sbr.rel (!%p13_p3) target bundleno = 4 (0x4), region = 67 }
 0x109   :  { %391 = vsyncpa [#allocation3], 1 }
 0x10a   :  { %393 = vsyncpa [#allocation3 + $0x1], 1 }

</bundles_post_ra>
